<compile_context>
chip_gen: v7x
topology: tpu7x:2x2x1
jax: 0.10.0
libtpu: 0.0.40
codegen_flags: <defaults>
</compile_context>

<pallas_src>
import jax
import jax.numpy as jnp
from jax import lax
from jax.experimental import pallas as pl
from jax.experimental.pallas import tpu as pltpu


def _round_up(x, m):
    return ((x + m - 1) // m) * m


def _round_down(x, m):
    return (x // m) * m


# ------------------------------------------------------------------
# fused NoReFT kernel: out = x + (x @ Wd^T + bd) @ Wp
# ------------------------------------------------------------------
def _noreft_kernel(x_ref, wd_ref, bd_ref, wp_ref, o_ref):
    # x_ref: (TM, D)   wd/wp: (r, D)   bd: (1, r)   o_ref: (TM, D)
    x = x_ref[...]                                    # native dtype, MXU LHS

    # delta = x @ (Ws - Wp)^T + (bs - bp)  -> (TM, r), f32 accumulation.
    # Contract x dim 1 (D) against Wd dim 1 (D); no transposed weight copy.
    dn_xt = (((1,), (1,)), ((), ()))
    delta = lax.dot_general(x, wd_ref[...], dn_xt,
                            preferred_element_type=jnp.float32) + bd_ref[...]

    # back = delta @ Wp : contract delta dim 1 (r) against Wp dim 0 (r) -> (TM, D).
    dn_back = (((1,), (0,)), ((), ()))
    back = lax.dot_general(delta.astype(wp_ref.dtype), wp_ref[...], dn_back,
                           preferred_element_type=jnp.float32)

    # Residual add in f32 (matches PyTorch's fp32 upcast), cast back to x dtype.
    o_ref[...] = (x.astype(jnp.float32) + back).astype(o_ref.dtype)


def noreft_intervention(x, wp, bp, ws, bs, *, block_m=None, vmem_limit_bytes=None):
    """NoreftIntervention.forward (eval mode).

    x  : (..., D)  input hidden states (any float dtype)
    wp : (r, D)    proj_layer.weight      (PyTorch layout)
    bp : (r,)      proj_layer.bias
    ws : (r, D)    learned_source.weight  (PyTorch layout)
    bs : (r,)      learned_source.bias
    returns (..., D) in x.dtype
    """
    orig_shape = x.shape
    orig_dtype = x.dtype
    D = orig_shape[-1]
    r = wp.shape[0]

    x2 = x.reshape(-1, D)
    M = x2.shape[0]

    # ---- fold the two down-projections (tiny (r,D)/(r,) ops, hoisted once) ----
    w_dtype = wp.dtype
    wd = (ws.astype(jnp.float32) - wp.astype(jnp.float32)).astype(w_dtype)
    bd = (bs.astype(jnp.float32) - bp.astype(jnp.float32)).reshape(1, r)

    # ---- row-tile sizing from a VMEM budget (generation-safe) ----------------
    in_b = jnp.dtype(orig_dtype).itemsize
    # per-row VMEM cost: double-buffered in + out blocks at native dtype plus
    # ~12 B/elem of f32 temporaries (back-projection, cast) in the kernel body.
    row_bytes = D * (2 * in_b + 2 * in_b + 12)
    if block_m is None:
        budget = 36 << 20           # keeps the total well under v7x's 64 MiB/TC
        tm = max(budget // max(row_bytes, 1), 64)
        tm = min(tm, 1024)
    else:
        tm = block_m
    tm = min(tm, _round_up(M, 8))
    if tm >= 128:
        tm = _round_down(tm, 128)   # MXU-row friendly on v5e/v6e/v7x
    else:
        tm = _round_up(max(tm, 8), 8)

    grid_m = pl.cdiv(M, tm)
    # Prefer >= 2 grid steps so v7x's two TensorCores both get work (and the
    # DMA/compute pipeline has something to overlap).
    if grid_m < 2 and M > 8:
        tm = max(8, _round_up(pl.cdiv(M, 2), 8))
        grid_m = pl.cdiv(M, tm)

    if vmem_limit_bytes is None:
        w_b = jnp.dtype(w_dtype).itemsize
        est = row_bytes * tm + 4 * r * D * w_b + (1 << 20)
        vmem_limit_bytes = int(min(max(est * 5 // 4, 16 << 20), 60 << 20))

    cost = pl.CostEstimate(
        flops=4 * M * r * D,                       # two (M,D)x(D,r)-class matmuls
        transcendentals=0,
        bytes_accessed=2 * M * D * in_b + 2 * r * D * jnp.dtype(w_dtype).itemsize,
    )

    out = pl.pallas_call(
        _noreft_kernel,
        out_shape=jax.ShapeDtypeStruct((M, D), orig_dtype),
        grid=(grid_m,),
        in_specs=[
            pl.BlockSpec((tm, D), lambda i: (i, 0)),   # x rows (ragged last block masked)
            pl.BlockSpec((r, D), lambda i: (0, 0)),    # Wd = Ws - Wp (resident)
            pl.BlockSpec((1, r), lambda i: (0, 0)),    # bd = bs - bp
            pl.BlockSpec((r, D), lambda i: (0, 0)),    # Wp (back-projection)
        ],
        out_specs=pl.BlockSpec((tm, D), lambda i: (i, 0)),
        compiler_params=pltpu.CompilerParams(
            # Row axis is independent -> shard across v7x's 2 TensorCores;
            # harmless on single-TC v5e/v6e.
            dimension_semantics=("parallel",),
            vmem_limit_bytes=vmem_limit_bytes,
        ),
        cost_estimate=cost,
    )(x2, wd, bd.astype(jnp.float32), wp)

    return out.reshape(orig_shape)


# ------------------------------------------------------------------
# reference (plain JAX, un-folded fp32 path) for correctness check
# ------------------------------------------------------------------
def noreft_reference(x, wp, bp, ws, bs):
    xf = x.astype(jnp.float32)
    proj_base = xf @ wp.T + bp
    src = xf @ ws.T + bs
    out = xf + (src - proj_base) @ wp
    return out.astype(x.dtype)


if __name__ == "__main__":
    # Small shapes consistent with the module: batch=2, seq=8, embed_dim=32, r=8.
    B, S, D, R = 2, 8, 32, 8

    key = jax.random.PRNGKey(0)
    kx, kwp, kbp, kws, kbs = jax.random.split(key, 5)

    x = jax.random.normal(kx, (B, S, D), jnp.float32)
    wp = jax.random.normal(kwp, (R, D), jnp.float32) * 0.05   # proj_layer.weight
    bp = jax.random.normal(kbp, (R,), jnp.float32) * 0.05     # proj_layer.bias
    ws = jax.random.normal(kws, (R, D), jnp.float32) * 0.05   # learned_source.weight
    bs = jax.random.normal(kbs, (R,), jnp.float32) * 0.05     # learned_source.bias

    fwd = jax.jit(noreft_intervention)
    out = fwd(x, wp, bp, ws, bs)
    jax.block_until_ready(out)

    ref = noreft_reference(x, wp, bp, ws, bs)

    assert out.shape == (B, S, D)
    assert out.dtype == x.dtype
    assert bool(jnp.all(jnp.isfinite(out)))
    assert bool(jnp.allclose(out, ref, atol=1e-4, rtol=1e-4))

    print("KERNEL_OK")
</pallas_src>

<mosaic_0001>
module attributes {stable_mosaic.version = 11 : i64} {
  func.func @_noreft_kernel(%arg0: i32, %arg1: memref<8x32xf32, #tpu.memory_space<vmem>>, %arg2: memref<8x32xf32, #tpu.memory_space<vmem>>, %arg3: memref<1x8xf32, #tpu.memory_space<vmem>>, %arg4: memref<8x32xf32, #tpu.memory_space<vmem>>, %arg5: memref<8x32xf32, #tpu.memory_space<vmem>>) attributes {dimension_semantics = [#tpu.dimension_semantics<parallel>], iteration_bounds = array<i64: 2>, scalar_prefetch = 0 : i64, scratch_operands = 0 : i64, tpu.core_type = #tpu.core_type<tc>, window_params = [{transform_indices = @transform_0, window_bounds = array<i64: 8, 32>}, {pipeline_mode = #tpu.pipeline_mode<synchronous>, transform_indices = @transform_1, window_bounds = array<i64: 8, 32>}, {pipeline_mode = #tpu.pipeline_mode<synchronous>, transform_indices = @transform_2, window_bounds = array<i64: 1, 8>}, {pipeline_mode = #tpu.pipeline_mode<synchronous>, transform_indices = @transform_3, window_bounds = array<i64: 8, 32>}, {transform_indices = @transform_4, window_bounds = array<i64: 8, 32>}]} {
    %c0 = arith.constant 0 : index
    %c0_0 = arith.constant 0 : index
    %0 = vector.load %arg1[%c0, %c0_0] : memref<8x32xf32, #tpu.memory_space<vmem>>, vector<8x32xf32>
    %c0_1 = arith.constant 0 : index
    %c0_2 = arith.constant 0 : index
    %1 = vector.load %arg2[%c0_1, %c0_2] : memref<8x32xf32, #tpu.memory_space<vmem>>, vector<8x32xf32>
    %cst = arith.constant dense<0.000000e+00> : vector<8x8xf32>
    %2 = tpu.matmul %0, %1, %cst {dimension_numbers = #tpu.dot_dimension_numbers<[1], [1], [0], [0], [0, 0, 1, 0], [], []>} : vector<8x32xf32>, vector<8x32xf32>, vector<8x8xf32> -> vector<8x8xf32>
    %c0_3 = arith.constant 0 : index
    %c0_4 = arith.constant 0 : index
    %3 = vector.load %arg3[%c0_3, %c0_4] : memref<1x8xf32, #tpu.memory_space<vmem>>, vector<1x8xf32>
    %4 = vector.broadcast %3 : vector<1x8xf32> to vector<8x8xf32>
    %5 = arith.addf %2, %4 : vector<8x8xf32>
    %c0_5 = arith.constant 0 : index
    %c0_6 = arith.constant 0 : index
    %6 = vector.load %arg4[%c0_5, %c0_6] : memref<8x32xf32, #tpu.memory_space<vmem>>, vector<8x32xf32>
    %cst_7 = arith.constant dense<0.000000e+00> : vector<8x32xf32>
    %7 = tpu.matmul %5, %6, %cst_7 {dimension_numbers = #tpu.dot_dimension_numbers<[1], [0], [0], [1], [0, 0, 1, 1], [], []>} : vector<8x8xf32>, vector<8x32xf32>, vector<8x32xf32> -> vector<8x32xf32>
    %8 = arith.addf %0, %7 : vector<8x32xf32>
    %c0_8 = arith.constant 0 : index
    %c0_9 = arith.constant 0 : index
    %9 = vector.load %arg5[%c0_8, %c0_9] : memref<8x32xf32, #tpu.memory_space<vmem>>, vector<8x32xf32>
    tpu.vector_store %arg5[%c0_8, %c0_9], %8 {strides = array<i32>} : memref<8x32xf32, #tpu.memory_space<vmem>>, vector<8x32xf32>,
    return
  }
  func.func @transform_0(%arg0: i32) -> (i32, i32) {
    %c0_i32 = arith.constant 0 : i32
    %c0_i32_0 = arith.constant 0 : i32
    return %arg0, %c0_i32 : i32, i32
  }
  func.func @transform_1(%arg0: i32) -> (i32, i32) {
    %c0_i32 = arith.constant 0 : i32
    %c0_i32_0 = arith.constant 0 : i32
    %c0_i32_1 = arith.constant 0 : i32
    return %c0_i32, %c0_i32_0 : i32, i32
  }
  func.func @transform_2(%arg0: i32) -> (i32, i32) {
    %c0_i32 = arith.constant 0 : i32
    %c0_i32_0 = arith.constant 0 : i32
    %c0_i32_1 = arith.constant 0 : i32
    return %c0_i32, %c0_i32_0 : i32, i32
  }
  func.func @transform_3(%arg0: i32) -> (i32, i32) {
    %c0_i32 = arith.constant 0 : i32
    %c0_i32_0 = arith.constant 0 : i32
    %c0_i32_1 = arith.constant 0 : i32
    return %c0_i32, %c0_i32_0 : i32, i32
  }
  func.func @transform_4(%arg0: i32) -> (i32, i32) {
    %c0_i32 = arith.constant 0 : i32
    %c0_i32_0 = arith.constant 0 : i32
    return %arg0, %c0_i32 : i32, i32
  }
}

</mosaic_0001>

<bundles_post_ra>
// kernel: sub.2
= control target key start
LH: loop header
LB: loop body
LE: loop exit
PB: predicated region body
PF: predicated region fallthrough
CT: control target
= control target key end

     0   :  { %3 = vsyncpa [#allocation1], 0  ;;  %s46_s9 = smov [#allocation0]   ;;  %s80_s0 = inlined_call_operand.hbm [shape: f32[8,32], index: 0, kind: input, shape index: {}]   ;;  %s81_s1 = inlined_call_operand.vmem [shape: f32[8,32], index: 1, kind: input, shape index: {}]   ;;  %s82_s2 = inlined_call_operand.vmem [shape: f32[8,32], index: 2, kind: output, shape index: {}]  }
   0x1   :  { %s8_s10 = sshll.u32 %s46_s9, 4  ;;  %s22_s13 = scalar_lea.hbm %s80_s0, 128  ;;  %s9_s10 = int_to_ptr.vmem [resolvable:$true] %s8_s10 }
   0x2   :  { %p23_p0 = scmp.ne.s32.totalorder %s80_s0, %s22_s13  ;;  %p26_p1 = scmp.lt.u32.totalorder %s22_s13, %s80_s0 }
   0x4   :  { %p28_p2 = pnand %p26_p1, %p23_p0 }
   0x6   :  { %31 = shalt.err (!%p28_p2)
}
   0x7   :  { %s32_s18 = scalar_lea.vmem %s9_s10, 128  ;;  %p37_p4 = scmp.lt.s32.totalorder %s9_s10, %s9_s10 }
   0x8   :  { %p33_p3 = scmp.ne.s32.totalorder %s9_s10, %s32_s18  ;;  %p38_p5 = scmp.lt.s32.totalorder %s32_s18, %s32_s18 }
   0xa   :  { %p39_p6 = por %p38_p5, %p37_p4 }
   0xc   :  { %p40_p7 = pnand %p39_p6, %p33_p3 }
   0xe   :  { %43 = shalt.err (!%p40_p7)
}
   0xf   :  { %11 = dma.hbm_to_vmem [thread:$0]  %s80_s0, 128, %s9_s10, [#allocation1]  }
  0x10   :  { %44 = dma.done.wait [#allocation1], 128  }
  0x11   :  { %45 = vsyncadd [#allocation1], 4294967168  ;;  %v13_v0 = vld [vmem:[#allocation0] sm:$0xff] }
  0x12   :  { %v14_v1 = vld [vmem:[%s81_s1] sm:$0xff] }
  0x13   :  { %v17_v2 = vsub.f32 %v13_v0, %v14_v1 }
  0x15   :  { %19 = vst [vmem:[%s82_s2] sm:$0xff] %v17_v2 }
  0x16   :  { %20 = vsyncpa [#allocation1], 1 }

// kernel: noreft_intervention.1
= control target key start
LH: loop header
LB: loop body
LE: loop exit
PB: predicated region body
PF: predicated region fallthrough
CT: control target
= control target key end

     0   :  { %9 = vsyncpa [#allocation3], 0  ;;  %s702_s0 = inlined_call_operand.vmem [shape: f32[16,32], index: 0, kind: input, shape index: {}]   ;;  %s703_s1 = inlined_call_operand.vmem [shape: f32[8,32], index: 1, kind: input, shape index: {}]   ;;  %s704_s2 = inlined_call_operand.vmem [shape: f32[1,8], index: 2, kind: input, shape index: {}]   ;;  %s705_s3 = inlined_call_operand.vmem [shape: f32[8,32], index: 3, kind: input, shape index: {}]   ;;  %s706_s4 = inlined_call_operand.hbm [shape: f32[16,32], index: 4, kind: output, shape index: {}]  }
   0x1   :  { %11 = vsyncpa [#allocation3 + $0x1], 0  ;;  %s590_s15 = smov 0   ;;  %s592_s16 = smov 0  }
   0x2   :  { %s594_s17 = smov 0   ;;  %s596_s18 = smov 0  }
   0x3 LB: > { %s611_s19 = sadd.s32 4294967295, %s560_s18   ;;  %s429_s20 = sadd.s32 4294967294, %s560_s18   ;;  %s560_s18 = sphi %s596_s18, %s712_s18   ;;  %s556_s17 = sphi %s594_s17, %s711_s17   ;;  %s552_s16 = sphi %s592_s16, %s710_s16   ;;  %s548_s15 = sphi %s590_s15, %s709_s15  }
   0x4   : > { %s615_s21 = sadd.s32 1, %s560_s18   ;;  %s113_s22 = sadd.s32 1, %s556_s17 }
   0x5   : > { %s110_s23 = ssub.s32 %s560_s18, %s615_s21  ;;  %p123_p0 = scmp.ne.s32.totalorder %s556_s17, %s552_s16 }
   0x6   : > { %p111_p1 = scmp.eq.s32.totalorder %s110_s23, 0  ;;  %p124_p2 = scmp.eq.s32.totalorder %s611_s19, 1 }
   0x7   : > { %p129_p3 = scmp.ne.s32.totalorder %s552_s16, %s548_s15  ;;  %p130_p4 = scmp.eq.s32.totalorder %s429_s20, 1 }
   0x8   : > { %s626_s24 = scalar_select %p111_p1, %s556_s17, %s113_s22  }
   0x9   : > { %p628_p5 = por %p124_p2, %p123_p0  ;;  %p632_p6 = por %p130_p4, %p129_p3 }
   0xa   : > { %p432_p7 = scmp.ge.s32.totalorder %s560_s18, 1  ;;  %p164_p8 = scmp.lt.s32.totalorder %s560_s18, 3 }
   0xc   : > { %p165_p9 = pnand %p432_p7, %p164_p8 }
   0xd   : > { %v194_v0 = vld [vmem:[%s703_s1] sm:$0xff] (!%p165_p9)  ;;  %vm202_vm0 = vcmask (!%p165_p9), 261120   ;;  %p189_p10 = scmp.lt.s32.totalorder (!%p165_p9), %s611_s19, 1  ;;  %v562_v1 = vmov (!%p165_p9), 0.0   ;;  %vm563_vm1 = vmmov (!%p165_p9), 0   ;;  %vm280_vm2 = vcmask (!%p165_p9), 64512  }
   0xe   : > { %168 = sbr.rel (%p165_p9) target bundleno = 468 (0x1d4), region = 36  ;;  %447 = vmatprep.subr.mxu0 (!%p165_p9), %v562_v1  ;;  %449 = vmatprep.mubr.msk.f32.mxu0 (!%p165_p9), %vm563_vm1, %v562_v1  ;;  %v279_v3 = vld [vmem:[%s705_s3] sm:$0xff] (!%p165_p9)  ;;  %s186_s12 = sand.u32 (!%p165_p9), 1, %s552_s16  }
   0xf   : > { %448 = vmatpush3.xpose.msk.msra.mxu0 (!%p165_p9), %vm202_vm0, %v194_v0  ;;  %452 = vmatprep.subr.mxu1 (!%p165_p9), %v562_v1  ;;  %v435_v4 = vld [vmem:[%s704_s2] ss:$0 sm:$0xff] (!%p165_p9)  ;;  %s433_s13 = sshll.u32 (!%p165_p9), %s186_s12, 3  ;;  %s440_s14 = sshll.u32 (!%p165_p9), %s611_s19, 7 }
  0x10   : > { %454 = vmatprep.mubr.msk.f32.mxu1 (!%p165_p9), %vm563_vm1, %v562_v1  ;;  %453 = vmatpush3.msra.mxu1 (!%p165_p9), %v279_v3  ;;  %s188_s20 = scalar_lea.vmem (!%p165_p9), [#allocation2], %s433_s13  ;;  %s659_s28 = scalar_lea.hbm (!%p165_p9), %s706_s4, %s440_s14 }
  0x11   : > { %s370_s22 = sshll.u32 (!%p165_p9), %s188_s20, 4  ;;  %s661_s22 = int_to_ptr.vmem [resolvable:$true] %s370_s22 }
  0x15   : > { %s190_s29 = scalar_select %p189_p10, %s611_s19, 1 }
  0x16   : > { %s564_s19 = smov [#allocation2]  }
  0x17   : > { %s434_s30 = sshll.u32 %s190_s29, 3  ;;  %s357_s29 = scalar_lea.sflag [#allocation3], %s186_s12 }
  0x18   : > { %s192_s7 = scalar_lea.vmem %s702_s0, %s434_s30  ;;  %s498_s30 = scalar_lea.vmem %s661_s22, 128 }
  0x19   : > { %v193_v2 = vld [vmem:[%s192_s7] sm:$0xff]  ;;  %p499_p11 = scmp.ne.s32.totalorder %s661_s22, %s498_s30  ;;  %s502_s5 = sshll.u32 %s564_s19, 4  ;;  %s503_s5 = int_to_ptr.vmem [resolvable:$false] %s502_s5 }
  0x1a   : > { %450 = vmatmul.mubr.msk.f32.vlgmr.msra.gmra.mrb[0].mxu0 %vm202_vm0, %v193_v2  ;;  %s504_s6 = scalar_lea.vmem %s503_s5, 256  ;;  %p505_p0 = scmp.lt.s32.totalorder %s661_s22, %s503_s5 }
  0x1b   : > { %p500_p12 = pnand %p499_p11, %p628_p5  ;;  %p506_p1 = scmp.lt.s32.totalorder %s504_s6, %s498_s30 }
  0x1d   : > { %p501_p13 = pneg %p500_p12  ;;  %p507_p2 = por %p506_p1, %p505_p0 }
  0x1f   : > { %p508_p3 = pnand %p507_p2, %p501_p13 }
  0xed   : > { %v275_v5 = vpop.f32.mrb[0].mxu0 }
  0xee   : > { %v276_v6 = vadd.f32 %v435_v4, %v275_v5  ;;  %v451_v7 = vpop.f32.mrb[1].mxu0 }
  0xf0   : > { %455 = vmatmul.mubr.msk.f32.vlgmr.msra.gmra.mrb[0].mxu1 %vm280_vm2, %v276_v6 }
 0x1c3   : > { %v350_v8 = vpop.f32.mrb[0].mxu1 }
 0x1c4   : > { %v354_v9 = vadd.f32 %v350_v8, %v193_v2  ;;  %v456_v10 = vpop.f32.mrb[1].mxu1 }
 0x1c6   : > { %355 = vst.msk [vmem:[%s188_s20] sm:$0xff] %vm202_vm0, %v354_v9 }
 0x1c7   : > { %511 = shalt.err (!%p508_p3)
}
 0x1c8   : > { %s512_s7 = scalar_lea.hbm %s659_s28, 128  ;;  %s516_s10 = scalar_lea.hbm %s706_s4, 256 }
 0x1c9   : > { %p513_p4 = scmp.ne.s32.totalorder %s659_s28, %s512_s7  ;;  %p517_p9 = scmp.lt.u32.totalorder %s659_s28, %s706_s4 }
 0x1ca   : > { %p518_p10 = scmp.lt.u32.totalorder %s516_s10, %s512_s7  ;;  %p520_p12 = scmp.lt.u32.totalorder %s512_s7, %s659_s28 }
 0x1cb   : > { %p514_p7 = pnand %p513_p4, %p628_p5 }
 0x1cc   : > { %p519_p11 = por %p518_p10, %p517_p9 }
 0x1cd   : > { %p515_p8 = pneg %p514_p7 }
 0x1ce   : > { %p521_p13 = por %p520_p12, %p519_p11 }
 0x1d0   : > { %p522_p0 = pnand %p521_p13, %p515_p8 }
 0x1d2   : > { %525 = shalt.err (!%p522_p0)
}
 0x1d3   : > { %457 = dma.vmem_to_hbm [thread:$0]  (%p628_p5), %s661_s22, 128, %s659_s28, %s357_s29  }
 0x1d4 PF: > { %p463_p1 = scmp.ge.s32.totalorder %s560_s18, 2  ;;  %s382_s13 = sand.u32 1, %s548_s15  }
 0x1d5   : > { %s383_s14 = scalar_lea.sflag [#allocation3], %s382_s13 }
 0x1d6   : > { %p460_p2 = pnand %p463_p1, %p632_p6 }
 0x1d8   : > { %543 = dma.done.wait (!%p460_p2), %s383_s14, 128  }
 0x1d9   : > { %545 = vsyncadd (!%p460_p2), %s383_s14, 4294967168  ;;  %p14_p3 = scmp.ge.s32.totalorder %s615_s21, 4   ;;  %s709_s15 = smov %s552_s16 }
 0x1da   : > { %s710_s16 = smov %s556_s17  ;;  %s711_s17 = smov %s626_s24 }
 0x1db   : > { %s712_s18 = smov %s615_s21  ;;  %16 = sbr.rel (!%p14_p3) target bundleno = 3 (0x3), region = 71 }
 0x1e2   :  { %388 = vsyncpa [#allocation3], 1 }
 0x1e3   :  { %390 = vsyncpa [#allocation3 + $0x1], 1 }

</bundles_post_ra>
